<compile_context>
chip_gen: v7x
topology: tpu7x:2x2x1
jax: 0.10.0
libtpu: 0.0.40
codegen_flags: <defaults>
</compile_context>

<pallas_src>
import jax
import jax.numpy as jnp
from jax import lax
from jax.experimental import pallas as pl
from jax.experimental.pallas import tpu as pltpu

EPS = 1e-12            # F.normalize default eps (eps^2 = 1e-24 is a normal f32)
DEFAULT_TB = 1024      # 4 MiB f32 output tile at A=8, E=128; 8 MiB double-buffered


def aspect_emb_kernel(x_ref, wn2_ref, w_ref, o_ref):
    x = x_ref[...]                        # (TB, A)  per-row aspect weights
    wn2 = wn2_ref[...]                    # (1, A)   ||W[a]||^2 (precomputed)
    w = w_ref[...]                        # (A, E)   shared embedding table

    # max(||x*W||, eps) == sqrt(max(x^2 * ||W||^2, eps^2)); rsqrt -> EUP.
    # s[b, a] = x[b,a] / max(|x[b,a]| * ||W[a]||, eps)   -- tiny (TB, A) tensor.
    s = x * lax.rsqrt(jnp.maximum(x * x * wn2, EPS * EPS))

    tb_blk, num_asp, e_dim = o_ref.shape
    out_shape = (tb_blk, num_asp, e_dim)
    # One broadcast vmul per output vreg: scale splat over lanes, W over rows.
    o_ref[...] = (
        lax.broadcast_in_dim(s, out_shape, (0, 1))
        * lax.broadcast_in_dim(w, out_shape, (1, 2))
    ).astype(o_ref.dtype)


def aspect_emb(x, W, *, tb=DEFAULT_TB, out_dtype=jnp.float32):
    """x: (B, A) f32, W: (A, E) f32 -> (B, A, E) row-wise L2 normalized."""
    B, A = x.shape
    A2, E = W.shape
    assert A == A2

    x = x.astype(jnp.float32)
    W = W.astype(jnp.float32)

    tb = min(tb, B)
    # Keep >= 4 grid steps when the batch is large enough so the "parallel"
    # batch axis can actually be split across v7x's two TensorCores.
    if B >= 32 and pl.cdiv(B, tb) < 4:
        tb = max(8, pl.cdiv(pl.cdiv(B, 4), 8) * 8)
    grid = (pl.cdiv(B, tb),)

    # ||W[a]||^2 -- one-time (A,) reduce over the parameter, ~128x smaller
    # than the streamed output; removes the per-element in-kernel reduction.
    wn2 = jnp.sum(W * W, axis=-1)[None, :]                 # (1, A)

    # Explicit VMEM budget: 2x output tile + 2x x tile + resident W/wn2.
    out_tile_bytes = tb * A * E * 4
    x_tile_bytes = tb * A * 4
    needed = 2 * (out_tile_bytes + x_tile_bytes) + 2 * (A * E * 4 + A * 4)
    vmem_limit = min(max(needed + (2 << 20), 16 << 20), 48 << 20)

    return pl.pallas_call(
        aspect_emb_kernel,
        out_shape=jax.ShapeDtypeStruct((B, A, E), out_dtype),
        grid_spec=pltpu.PrefetchScalarGridSpec(
            num_scalar_prefetch=0,
            grid=grid,
            in_specs=[
                # Dense (tb, A) x tile -- one small contiguous DMA per step.
                pl.BlockSpec((tb, A), lambda i: (i, 0)),
                # Resident ||W[a]||^2 row.
                pl.BlockSpec((1, A), lambda i: (0, 0)),
                # Resident embedding table.
                pl.BlockSpec((A, E), lambda i: (0, 0)),
            ],
            out_specs=pl.BlockSpec((tb, A, E), lambda i: (i, 0, 0)),
        ),
        compiler_params=pltpu.CompilerParams(
            dimension_semantics=("parallel",),
            vmem_limit_bytes=vmem_limit,
        ),
    )(x, wn2, W)


def aspect_emb_ref(x, W):
    prod = x[:, :, None] * W[None, :, :]
    norm = jnp.sqrt(jnp.sum(prod * prod, axis=-1, keepdims=True))
    return prod / jnp.maximum(norm, EPS)


if __name__ == "__main__":
    # Small shapes consistent with the module: batch=2, num_asp=8, e_dim=128.
    B, NUM_ASP, E_DIM = 2, 8, 128

    key = jax.random.PRNGKey(0)
    kx, kw, kx2 = jax.random.split(key, 3)
    x = jax.random.normal(kx, (B, NUM_ASP), dtype=jnp.float32)
    x = x.at[0, 0].set(0.0)  # exercise the eps / zero-norm path
    W = jax.random.normal(kw, (NUM_ASP, E_DIM), dtype=jnp.float32)

    out = jax.block_until_ready(aspect_emb(x, W))
    ref = aspect_emb_ref(x, W)
    assert out.shape == (B, NUM_ASP, E_DIM)
    assert jnp.allclose(out, ref, atol=1e-5, rtol=1e-5)

    # Multi-tile grid with a partial last tile (masked writeback path).
    B2 = 20
    x2 = jax.random.normal(kx2, (B2, NUM_ASP), dtype=jnp.float32)
    out2 = jax.block_until_ready(aspect_emb(x2, W, tb=8))
    ref2 = aspect_emb_ref(x2, W)
    assert jnp.allclose(out2, ref2, atol=1e-5, rtol=1e-5)

    print("KERNEL_OK")
</pallas_src>

<mosaic_0001>
module attributes {stable_mosaic.version = 11 : i64} {
  func.func @aspect_emb_kernel(%arg0: i32, %arg1: memref<2x8xf32, #tpu.memory_space<vmem>>, %arg2: memref<1x8xf32, #tpu.memory_space<vmem>>, %arg3: memref<8x128xf32, #tpu.memory_space<vmem>>, %arg4: memref<2x8x128xf32, #tpu.memory_space<vmem>>) attributes {dimension_semantics = [#tpu.dimension_semantics<parallel>], iteration_bounds = array<i64: 1>, scalar_prefetch = 0 : i64, scratch_operands = 0 : i64, tpu.core_type = #tpu.core_type<tc>, window_params = [{transform_indices = @transform_0, window_bounds = array<i64: 2, 8>}, {pipeline_mode = #tpu.pipeline_mode<synchronous>, transform_indices = @transform_1, window_bounds = array<i64: 1, 8>}, {pipeline_mode = #tpu.pipeline_mode<synchronous>, transform_indices = @transform_2, window_bounds = array<i64: 8, 128>}, {transform_indices = @transform_3, window_bounds = array<i64: 2, 8, 128>}]} {
    %c0 = arith.constant 0 : index
    %c0_0 = arith.constant 0 : index
    %0 = vector.load %arg1[%c0, %c0_0] : memref<2x8xf32, #tpu.memory_space<vmem>>, vector<2x8xf32>
    %c0_1 = arith.constant 0 : index
    %c0_2 = arith.constant 0 : index
    %1 = vector.load %arg2[%c0_1, %c0_2] : memref<1x8xf32, #tpu.memory_space<vmem>>, vector<1x8xf32>
    %c0_3 = arith.constant 0 : index
    %c0_4 = arith.constant 0 : index
    %2 = vector.load %arg3[%c0_3, %c0_4] : memref<8x128xf32, #tpu.memory_space<vmem>>, vector<8x128xf32>
    %3 = arith.mulf %0, %0 : vector<2x8xf32>
    %4 = vector.broadcast %1 : vector<1x8xf32> to vector<2x8xf32>
    %5 = arith.mulf %3, %4 : vector<2x8xf32>
    %cst = arith.constant 1.000000e-24 : f32
    %6 = vector.broadcast %cst : f32 to vector<2x8xf32>
    %7 = arith.maximumf %5, %6 : vector<2x8xf32>
    %8 = math.rsqrt %7 : vector<2x8xf32>
    %9 = arith.mulf %0, %8 : vector<2x8xf32>
    %10 = vector.shape_cast %9 : vector<2x8xf32> to vector<2x8x1xf32>
    %11 = vector.broadcast %10 : vector<2x8x1xf32> to vector<2x8x128xf32>
    %12 = vector.shape_cast %2 : vector<8x128xf32> to vector<1x8x128xf32>
    %13 = vector.broadcast %12 : vector<1x8x128xf32> to vector<2x8x128xf32>
    %14 = arith.mulf %11, %13 : vector<2x8x128xf32>
    %c0_5 = arith.constant 0 : index
    %c0_6 = arith.constant 0 : index
    %c0_7 = arith.constant 0 : index
    %15 = vector.load %arg4[%c0_5, %c0_6, %c0_7] : memref<2x8x128xf32, #tpu.memory_space<vmem>>, vector<2x8x128xf32>
    tpu.vector_store %arg4[%c0_5, %c0_6, %c0_7], %14 {strides = array<i32>} : memref<2x8x128xf32, #tpu.memory_space<vmem>>, vector<2x8x128xf32>,
    return
  }
  func.func @transform_0(%arg0: i32) -> (i32, i32) {
    %c0_i32 = arith.constant 0 : i32
    %c0_i32_0 = arith.constant 0 : i32
    return %arg0, %c0_i32 : i32, i32
  }
  func.func @transform_1(%arg0: i32) -> (i32, i32) {
    %c0_i32 = arith.constant 0 : i32
    %c0_i32_0 = arith.constant 0 : i32
    %c0_i32_1 = arith.constant 0 : i32
    return %c0_i32, %c0_i32_0 : i32, i32
  }
  func.func @transform_2(%arg0: i32) -> (i32, i32) {
    %c0_i32 = arith.constant 0 : i32
    %c0_i32_0 = arith.constant 0 : i32
    %c0_i32_1 = arith.constant 0 : i32
    return %c0_i32, %c0_i32_0 : i32, i32
  }
  func.func @transform_3(%arg0: i32) -> (i32, i32, i32) {
    %c0_i32 = arith.constant 0 : i32
    %c0_i32_0 = arith.constant 0 : i32
    %c0_i32_1 = arith.constant 0 : i32
    return %arg0, %c0_i32, %c0_i32_0 : i32, i32, i32
  }
}

</mosaic_0001>

<bundles_post_ra>
// kernel: tpu_custom_call.1
= control target key start
LH: loop header
LB: loop body
LE: loop exit
PB: predicated region body
PF: predicated region fallthrough
CT: control target
= control target key end

     0   :  { %8 = vsyncpa [#allocation3], 0  ;;  %s233_s0 = inlined_call_operand.hbm [shape: f32[2,8], index: 0, kind: input, shape index: {}]   ;;  %s234_s1 = inlined_call_operand.vmem [shape: f32[1,8], index: 1, kind: input, shape index: {}]   ;;  %s235_s2 = inlined_call_operand.hbm [shape: f32[8,128], index: 2, kind: input, shape index: {}]   ;;  %s236_s3 = inlined_call_operand.hbm [shape: f32[2,8,128], index: 3, kind: output, shape index: {}]  }
   0x1   :  { %9 = vsyncpa [#allocation6], 0 }
   0x2   :  { %10 = vsyncpa [#allocation4], 0  ;;  %s169_s12 = smov [#allocation2]   ;;  %s170_s14 = smov [#allocation5]  }
   0x3   :  { %s17_s13 = sshll.u32 %s169_s12, 4  ;;  %s29_s15 = sshll.u32 %s170_s14, 4  ;;  %s18_s13 = int_to_ptr.vmem [resolvable:$true] %s17_s13  ;;  %s30_s15 = int_to_ptr.vmem [resolvable:$true] %s29_s15 }
   0x4   :  { %s97_s18 = scalar_lea.hbm %s233_s0, 32 }
   0x5   :  { %p98_p0 = scmp.ne.s32.totalorder %s233_s0, %s97_s18  ;;  %p101_p1 = scmp.lt.u32.totalorder %s97_s18, %s233_s0 }
   0x7   :  { %p103_p2 = pnand %p101_p1, %p98_p0 }
   0x9   :  { %106 = shalt.err (!%p103_p2)
}
   0xa   :  { %s107_s23 = scalar_lea.vmem %s18_s13, 32  ;;  %p112_p4 = scmp.lt.s32.totalorder %s18_s13, %s18_s13 }
   0xb   :  { %p108_p3 = scmp.ne.s32.totalorder %s18_s13, %s107_s23  ;;  %p113_p5 = scmp.lt.s32.totalorder %s107_s23, %s107_s23 }
   0xd   :  { %p114_p6 = por %p113_p5, %p112_p4 }
   0xf   :  { %p115_p7 = pnand %p114_p6, %p108_p3 }
  0x11   :  { %118 = shalt.err (!%p115_p7)
}
  0x12   :  { %20 = dma.hbm_to_vmem [thread:$0]  %s233_s0, 32, %s18_s13, [#allocation3]  }
  0x13   :  { %s119_s28 = scalar_lea.hbm %s235_s2, 128 }
  0x14   :  { %p120_p8 = scmp.ne.s32.totalorder %s235_s2, %s119_s28  ;;  %p123_p9 = scmp.lt.u32.totalorder %s119_s28, %s235_s2 }
  0x16   :  { %p125_p10 = pnand %p123_p9, %p120_p8 }
  0x18   :  { %128 = shalt.err (!%p125_p10)
}
  0x19   :  { %s129_s6 = scalar_lea.vmem %s30_s15, 128  ;;  %p134_p12 = scmp.lt.s32.totalorder %s30_s15, %s30_s15 }
  0x1a   :  { %p130_p11 = scmp.ne.s32.totalorder %s30_s15, %s129_s6  ;;  %p135_p13 = scmp.lt.s32.totalorder %s129_s6, %s129_s6 }
  0x1c   :  { %p136_p0 = por %p135_p13, %p134_p12 }
  0x1e   :  { %p137_p1 = pnand %p136_p0, %p130_p11 }
  0x20   :  { %140 = shalt.err (!%p137_p1)
}
  0x21   :  { %32 = dma.hbm_to_vmem [thread:$0]  %s235_s2, 128, %s30_s15, [#allocation6]  }
  0x22   :  { %163 = dma.done.wait [#allocation3], 32  }
  0x23   :  { %164 = vsyncadd [#allocation3], 4294967264 }
  0x24   :  { %165 = dma.done.wait [#allocation6], 128  }
  0x25   :  { %166 = vsyncadd [#allocation6], 4294967168  ;;  %v39_v0 = vld [vmem:[#allocation2] sm:$0x3]  ;;  %v53_v5 = vlaneseq  ;;  %v41_v13 = vld [vmem:[#allocation5] sm:$0xff]  ;;  %s171_s2 = smov [#allocation7]  }
  0x26   :  { %v89_v1 = vld [vmem:[%s234_s1] ss:$0 sm:$0xff]  ;;  %v42_v2 = vmul.f32 %v39_v0, %v39_v0  ;;  %s76_s10 = sshll.u32 %s171_s2, 4  ;;  %s77_s10 = int_to_ptr.vmem [resolvable:$true] %s76_s10 }
  0x27   :  { %v54_v6 = vshrl.u32 %v53_v5, 7  ;;  %s141_s1 = scalar_lea.vmem %s77_s10, 256  ;;  %p146_p3 = scmp.lt.s32.totalorder %s77_s10, %s77_s10 }
  0x28   :  { %v49_v3 = vmul.f32 %v89_v1, %v42_v2  ;;  %p142_p2 = scmp.ne.s32.totalorder %s77_s10, %s141_s1  ;;  %p147_p4 = scmp.lt.s32.totalorder %s141_s1, %s141_s1 }
  0x29   :  { %v55_v7 = vsub.s32 0, %v54_v6  ;;  %v62_v10 = vsub.s32 1, %v54_v6 }
  0x2a   :  { %v50_v4 = vmax.f32 %v49_v3, 1e-24  ;;  %p148_p5 = por %p147_p4, %p146_p3 }
  0x2c   :  { %95 = vrsqrt.f32 %v50_v4  ;;  %p149_p6 = pnand %p148_p5, %p142_p2 }
  0x36   :  { %v96_v8 = vpop.eup %95 }
  0x37   :  { %v52_v9 = vmul.f32 %v96_v8, %v39_v0 }
  0x39   :  { %v56_v11 = vrot.slane %v52_v9, %v55_v7  ;;  %v63_v12 = vrot.slane %v52_v9, %v62_v10 }
  0x3b   :  { %58 = vbcast.lane.b32.xlu0 %v56_v11, 256 }
  0x3f   :  { %65 = vbcast.lane.b32.xlu0 %v63_v12, 256 }
  0xad   :  { %v59_v14 = vpop.permute.xlu0 %58 }
  0xae   :  { %v67_v15 = vmul.f32 %v59_v14, %v41_v13 }
  0xb0   :  { %69 = vst [vmem:[#allocation7] sm:$0xff] %v67_v15 }
  0xb1   :  { %v66_v16 = vpop.permute.xlu0 %65 }
  0xb2   :  { %v68_v17 = vmul.f32 %v66_v16, %v41_v13 }
  0xb4   :  { %70 = vst [vmem:[#allocation7 + $0x8] sm:$0xff] %v68_v17 }
  0xb5   :  { %152 = shalt.err (!%p149_p6)
}
  0xb6   :  { %s153_s13 = scalar_lea.hbm %s236_s3, 256 }
  0xb7   :  { %p154_p7 = scmp.ne.s32.totalorder %s236_s3, %s153_s13  ;;  %p157_p8 = scmp.lt.u32.totalorder %s153_s13, %s236_s3 }
  0xb9   :  { %p159_p9 = pnand %p157_p8, %p154_p7 }
  0xbb   :  { %162 = shalt.err (!%p159_p9)
}
  0xbc   :  { %s172_s18 = smov 128   ;;  %s173_s19 = smov 8  }
  0xbd   :  { %82 = dma.vmem_to_hbm [thread:$0]  %s77_s10, 256, %s236_s3, [#allocation4], %s172_s18, %s172_s18, %s173_s19  }
  0xbe   :  { %167 = dma.done.wait [#allocation4], 256  }
  0xbf   :  { %168 = vsyncadd [#allocation4], 4294967040 }
  0xc0   :  { %86 = vsyncpa [#allocation3], 1 }
  0xc1   :  { %87 = vsyncpa [#allocation6], 1 }
  0xc2   :  { %88 = vsyncpa [#allocation4], 1 }

</bundles_post_ra>
